<compile_context>
chip_gen: v6e
topology: v6e:2x2x1
jax: 0.10.0
libtpu: 0.0.40
codegen_flags: <defaults>
</compile_context>

<pallas_src>
import jax
import jax.numpy as jnp
from jax.experimental import pallas as pl
from jax.experimental.pallas import tpu as pltpu


def _round_up(a: int, b: int) -> int:
    return ((a + b - 1) // b) * b


def mv_kernel(x_ref, y_ref, o_ref, acc_ref):
    # grid = (M_tiles, K_tiles); axis 1 is the reduction over N.
    k = pl.program_id(1)

    @pl.when(k == 0)
    def _():
        acc_ref[...] = jnp.zeros_like(acc_ref)

    # (tm, tn) * (1, tn) -> sublane-broadcast multiply on the VPU, then a
    # cross-lane reduce (XLU). f32 accumulation regardless of input dtype.
    x_tile = x_ref[...].astype(jnp.float32)
    y_row = y_ref[...].astype(jnp.float32)
    acc_ref[...] += jnp.sum(x_tile * y_row, axis=1, keepdims=True)

    @pl.when(k == pl.num_programs(1) - 1)
    def _():
        o_ref[...] = acc_ref[...].astype(o_ref.dtype)


def mv(x, y, *, tm=512, tn=1024):
    """out[m] = sum_n x[m, n] * y[n]  (torch.mv semantics)."""
    M, N = x.shape
    assert y.shape == (N,)
    out_dtype = jnp.result_type(x.dtype, y.dtype)

    # Minimum sublane multiple for the packed dtype: f32 -> 8, bf16 -> 16, int8 -> 32.
    sub = max(8, 32 // jnp.dtype(x.dtype).itemsize)
    tm_eff = min(tm, _round_up(M, sub))
    tn_eff = min(tn, _round_up(N, 128))

    m_pad = _round_up(M, tm_eff)
    n_pad = _round_up(N, tn_eff)

    x_p = x
    if (m_pad, n_pad) != (M, N):
        x_p = jnp.pad(x, ((0, m_pad - M), (0, n_pad - N)))
    y_row = y.reshape(1, N)
    if n_pad != N:
        y_row = jnp.pad(y_row, ((0, 0), (0, n_pad - N)))

    grid = (m_pad // tm_eff, n_pad // tn_eff)

    out = pl.pallas_call(
        mv_kernel,
        out_shape=jax.ShapeDtypeStruct((m_pad, 1), out_dtype),
        grid_spec=pltpu.PrefetchScalarGridSpec(
            num_scalar_prefetch=0,
            grid=grid,
            in_specs=[
                # Streamed x tile: (tm, tn) at block (i, k).
                pl.BlockSpec((tm_eff, tn_eff), lambda i, k: (i, k)),
                # y as a lane-major (1, tn) row, re-used across all i.
                pl.BlockSpec((1, tn_eff), lambda i, k: (0, k)),
            ],
            # Output block is resident across the reduction axis.
            out_specs=pl.BlockSpec((tm_eff, 1), lambda i, k: (i, 0)),
            scratch_shapes=[pltpu.VMEM((tm_eff, 1), jnp.float32)],
        ),
        compiler_params=pltpu.CompilerParams(
            dimension_semantics=("parallel", "arbitrary"),
        ),
    )(x_p, y_row)
    return out.reshape(m_pad)[:M]


if __name__ == "__main__":
    key = jax.random.PRNGKey(0)
    kx, ky = jax.random.split(key)

    # Primary small test (matches the module's forward: out = torch.mv(x, y)).
    M, N = 16, 128
    x = jax.random.normal(kx, (M, N), dtype=jnp.float32)
    y = jax.random.normal(ky, (N,), dtype=jnp.float32)

    out = mv(x, y)
    jax.block_until_ready(out)
    ref = jnp.dot(x, y)
    assert out.shape == (M,)
    assert jnp.allclose(out, ref, atol=1e-5, rtol=1e-5)

    # Secondary check: non-multiple shapes exercise padding + the multi-step
    # reduction / accumulator path (grid > 1 on both axes).
    M2, N2 = 20, 200
    x2 = jax.random.normal(kx, (M2, N2), dtype=jnp.float32)
    y2 = jax.random.normal(ky, (N2,), dtype=jnp.float32)
    out2 = mv(x2, y2, tm=8, tn=128)
    jax.block_until_ready(out2)
    ref2 = jnp.dot(x2, y2)
    assert out2.shape == (M2,)
    assert jnp.allclose(out2, ref2, atol=1e-5, rtol=1e-5)

    print("KERNEL_OK")
</pallas_src>

<mosaic_0001>
module attributes {stable_mosaic.version = 11 : i64} {
  func.func @mv_kernel(%arg0: i32, %arg1: i32, %arg2: memref<16x128xf32, #tpu.memory_space<vmem>>, %arg3: memref<1x128xf32, #tpu.memory_space<vmem>>, %arg4: memref<16x1xf32, #tpu.memory_space<vmem>>, %arg5: memref<16x1xf32, #tpu.memory_space<vmem>>) attributes {dimension_semantics = [#tpu.dimension_semantics<parallel>, #tpu.dimension_semantics<arbitrary>], iteration_bounds = array<i64: 1, 1>, scalar_prefetch = 0 : i64, scratch_operands = 1 : i64, tpu.core_type = #tpu.core_type<tc>, window_params = [{transform_indices = @transform_0, window_bounds = array<i64: 16, 128>}, {transform_indices = @transform_1, window_bounds = array<i64: 1, 128>}, {transform_indices = @transform_2, window_bounds = array<i64: 16, 1>}]} {
    %c0_i32 = arith.constant 0 : i32
    %0 = arith.cmpi eq, %arg1, %c0_i32 : i32
    %1 = arith.extui %0 : i1 to i32
    %c0_i32_0 = arith.constant 0 : i32
    %2 = arith.cmpi ne, %1, %c0_i32_0 : i32
    scf.if %2 {
      %cst_10 = arith.constant 0.000000e+00 : f32
      %15 = vector.broadcast %cst_10 : f32 to vector<16x1xf32>
      %c0_11 = arith.constant 0 : index
      %c0_12 = arith.constant 0 : index
      %16 = vector.load %arg5[%c0_11, %c0_12] : memref<16x1xf32, #tpu.memory_space<vmem>>, vector<16x1xf32>
      tpu.vector_store %arg5[%c0_11, %c0_12], %15 {strides = array<i32>} : memref<16x1xf32, #tpu.memory_space<vmem>>, vector<16x1xf32>,
    } else {
    }
    %c0 = arith.constant 0 : index
    %c0_1 = arith.constant 0 : index
    %3 = vector.load %arg2[%c0, %c0_1] : memref<16x128xf32, #tpu.memory_space<vmem>>, vector<16x128xf32>
    %c0_2 = arith.constant 0 : index
    %c0_3 = arith.constant 0 : index
    %4 = vector.load %arg3[%c0_2, %c0_3] : memref<1x128xf32, #tpu.memory_space<vmem>>, vector<1x128xf32>
    %c0_4 = arith.constant 0 : index
    %c0_5 = arith.constant 0 : index
    %5 = vector.load %arg5[%c0_4, %c0_5] : memref<16x1xf32, #tpu.memory_space<vmem>>, vector<16x1xf32>
    %6 = vector.broadcast %4 : vector<1x128xf32> to vector<16x128xf32>
    %7 = arith.mulf %3, %6 : vector<16x128xf32>
    %cst = arith.constant dense<0.000000e+00> : vector<16xf32>
    %8 = vector.multi_reduction <add>, %7, %cst [1] : vector<16x128xf32> to vector<16xf32>
    %9 = vector.shape_cast %8 : vector<16xf32> to vector<16x1xf32>
    %10 = arith.addf %5, %9 : vector<16x1xf32>
    %c0_6 = arith.constant 0 : index
    %c0_7 = arith.constant 0 : index
    %11 = vector.load %arg5[%c0_6, %c0_7] : memref<16x1xf32, #tpu.memory_space<vmem>>, vector<16x1xf32>
    tpu.vector_store %arg5[%c0_6, %c0_7], %10 {strides = array<i32>} : memref<16x1xf32, #tpu.memory_space<vmem>>, vector<16x1xf32>,
    %c0_i32_8 = arith.constant 0 : i32
    %12 = arith.cmpi eq, %arg1, %c0_i32_8 : i32
    %13 = arith.extui %12 : i1 to i32
    %c0_i32_9 = arith.constant 0 : i32
    %14 = arith.cmpi ne, %13, %c0_i32_9 : i32
    scf.if %14 {
      %c0_10 = arith.constant 0 : index
      %c0_11 = arith.constant 0 : index
      %15 = vector.load %arg5[%c0_10, %c0_11] : memref<16x1xf32, #tpu.memory_space<vmem>>, vector<16x1xf32>
      %c0_12 = arith.constant 0 : index
      %c0_13 = arith.constant 0 : index
      %16 = vector.load %arg4[%c0_12, %c0_13] : memref<16x1xf32, #tpu.memory_space<vmem>>, vector<16x1xf32>
      tpu.vector_store %arg4[%c0_12, %c0_13], %15 {strides = array<i32>} : memref<16x1xf32, #tpu.memory_space<vmem>>, vector<16x1xf32>,
    } else {
    }
    return
  }
  func.func @transform_0(%arg0: i32, %arg1: i32) -> (i32, i32) {
    %c0_i32 = arith.constant 0 : i32
    return %arg0, %arg1 : i32, i32
  }
  func.func @transform_1(%arg0: i32, %arg1: i32) -> (i32, i32) {
    %c0_i32 = arith.constant 0 : i32
    %c0_i32_0 = arith.constant 0 : i32
    return %c0_i32, %arg1 : i32, i32
  }
  func.func @transform_2(%arg0: i32, %arg1: i32) -> (i32, i32) {
    %c0_i32 = arith.constant 0 : i32
    %c0_i32_0 = arith.constant 0 : i32
    return %arg0, %c0_i32 : i32, i32
  }
}

</mosaic_0001>

<bundles_post_ra>
// kernel: tpu_custom_call.1
= control target key start
LH: loop header
LB: loop body
LE: loop exit
PB: predicated region body
PF: predicated region fallthrough
CT: control target
= control target key end

     0   :  { %7 = vsyncpa [#allocation4], 0  ;;  %s93_s9 = smov [#allocation3]   ;;  %s130_s0 = inlined_call_operand.hbm [shape: f32[16,128], index: 0, kind: input, shape index: {}]   ;;  %s131_s1 = inlined_call_operand.vmem [shape: f32[1,128], index: 1, kind: input, shape index: {}]   ;;  %s132_s2 = inlined_call_operand.vmem [shape: f32[16,1], index: 2, kind: output, shape index: {}]  }
   0x1   :  { %s13_s10 = sshll.u32 %s93_s9, 4  ;;  %s14_s10 = int_to_ptr.vmem [resolvable:$true] %s13_s10 }
   0x2   :  { %s79_s11 = scalar_lea.vmem %s14_s10, 256  ;;  %p84_p1 = scmp.lt.s32.totalorder %s14_s10, %s14_s10 }
   0x3   :  { %p80_p0 = scmp.ne.s32.totalorder %s14_s10, %s79_s11  ;;  %p85_p2 = scmp.lt.s32.totalorder %s79_s11, %s79_s11 }
   0x5   :  { %p86_p3 = por %p85_p2, %p84_p1 }
   0x7   :  { %p87_p4 = pnand %p86_p3, %p80_p0 }
   0x9   :  { %90 = shalt.err (!%p87_p4)
}
   0xa   :  { %s94_s12 = smov 128   ;;  %s95_s13 = smov 8  }
   0xb   :  { %19 = dma.hbm_to_vmem [thread:$0]  %s130_s0, 256, %s14_s10, [#allocation4], %s94_s12, %s94_s12, %s95_s13  }
   0xc   :  { %91 = dma.done.wait [#allocation4], 256  }
   0xd   :  { %92 = vsyncadd [#allocation4], 4294967040  ;;  %vm29_vm0 = vcmask 7168   ;;  %v96_v0 = vmov 0.0   ;;  %v32_v1 = vld [vmem:[#allocation3] sm:$0xff]  ;;  %v33_v3 = vld [vmem:[#allocation3 + $0x8] sm:$0xff] }
   0xe   :  { %30 = vst.msk [vmem:[#allocation2] sm:$0xff] %vm29_vm0, %v96_v0  ;;  %31 = vst.msk [vmem:[#allocation2 + $0x8] sm:$0xff] %vm29_vm0, %v96_v0  ;;  %v66_v2 = vld [vmem:[%s131_s1] ss:$0 sm:$0xff] }
   0xf   :  { %v43_v4 = vmul.f32 %v66_v2, %v32_v1  ;;  %v44_v5 = vmul.f32 %v66_v2, %v33_v3 }
  0x11   :  { %45 = vadd.xlane.f32.xlu0 %v43_v4 }
  0x15   :  { %47 = vadd.xlane.f32.xlu0 %v44_v5  ;;  %v35_v6 = vld [vmem:[#allocation2] sm:$0xff]  ;;  %v36_v9 = vld [vmem:[#allocation2 + $0x8] sm:$0xff] }
  0x9a   :  { %v46_v7 = vpop.xlane.xlu0 %45 }
  0x9b   :  { %v49_v8 = vadd.f32 %v46_v7, %v35_v6 }
  0x9d   :  { %52 = vst.msk [vmem:[#allocation2] sm:$0xff] %vm29_vm0, %v49_v8 }
  0x9e   :  { %v48_v10 = vpop.xlane.xlu0 %47 }
  0x9f   :  { %v50_v11 = vadd.f32 %v48_v10, %v36_v9 }
  0xa1   :  { %53 = vst.msk [vmem:[#allocation2 + $0x8] sm:$0xff] %vm29_vm0, %v50_v11 }
  0xa4   :  { %v57_v12 = vld [vmem:[#allocation2] sm:$0xff] }
  0xa5   :  { %59 = vst.msk [vmem:[%s132_s2] sm:$0xff] %vm29_vm0, %v57_v12 }
  0xa8   :  { %v58_v13 = vld [vmem:[#allocation2 + $0x8] sm:$0xff] }
  0xa9   :  { %60 = vst.msk [vmem:[%s132_s2 + $0x8] sm:$0xff] %vm29_vm0, %v58_v13 }
  0xaa   :  { %65 = vsyncpa [#allocation4], 1 }

</bundles_post_ra>
